<compile_context>
chip_gen: v7x
topology: tpu7x:2x2x1
jax: 0.10.0
libtpu: 0.0.40
codegen_flags: <defaults>
</compile_context>

<pallas_src>
import functools
import math

import jax
import jax.numpy as jnp
from jax.experimental import pallas as pl
from jax.experimental.pallas import tpu as pltpu


# ----------------------------------------------------------------------------
# Deterministic sign-approximation composition.
# TODO(synk): the PyTorch module loads minimax degrees/coefficients from
# ./degreeResult/deg_<alpha>.txt and ./coeffResult/coeff_<alpha>.txt; those
# files are not available here, so we keep the same compositional structure
# with a deterministic in-script composition f(t)=1.5t-0.5t^3 applied 3 times.
# ----------------------------------------------------------------------------
_SGN_COMP_DEPTH = 3


def _sgn_approx(x):
    # relu_dict['B'] == 1.0 inside max_approx, so x/B is a no-op, and the
    # in-range check |x| <= 1 always holds after the ker2/ker3 pre-scaling.
    # Odd cubic evaluated as x*(1.5 - 0.5*x^2) (no dead +0 Horner terms).
    # TODO(synk): bf16 evaluation on v6e/v7x would ~2x VALU throughput but
    # changes the numerics of an HE-calibrated approximation; kept f32.
    for _ in range(_SGN_COMP_DEPTH):
        x = x * (1.5 - 0.5 * (x * x))
    return x


def _max_approx(x, y):
    d = x - y
    return (x + y + d * _sgn_approx(d)) * 0.5


# ----------------------------------------------------------------------------
# Pallas kernel: one lane-dense (TILE_R, 128) slab of the flattened problem.
#   x_ref: (KK, TILE_R, 128)  -- one raw (unscaled) slab per window offset
#   o_ref: (TILE_R, 128)      -- approximate max over the KK slabs
# ----------------------------------------------------------------------------
def _maxpool_kernel(x_ref, o_ref, *, kernel_size, scaling_factor):
    sf = scaling_factor
    half_inv_sf = 0.5 / scaling_factor   # precomputed reciprocal (no in-kernel div)

    def amax_leaf(a, b):
        # First-level approximate max with the `* sf + 0.5` affine folded in:
        #   a' = a*sf + 0.5, b' = b*sf + 0.5, d' = (a-b)*sf
        #   max'(a',b') = ((a+b)*sf + 1 + d'*sgn(d')) * 0.5
        d = (a - b) * sf
        return ((a + b) * sf + 1.0 + d * _sgn_approx(d)) * 0.5

    def amax(a, b):
        d = a - b
        return (a + b + d * _sgn_approx(d)) * 0.5

    def amax_final(a, b):
        # Last approximate max with the (res - 0.5)/sf epilogue folded in:
        # ((a + b + d*s)*0.5 - 0.5)/sf == (a + b - 1 + d*s) * (0.5/sf)
        d = a - b
        return (a + b - 1.0 + d * _sgn_approx(d)) * half_inv_sf

    if kernel_size == 2:
        s11 = amax_leaf(x_ref[0], x_ref[1])
        s12 = amax_leaf(x_ref[2], x_ref[3])
        o_ref[...] = amax_final(s11, s12)
    elif kernel_size == 3:
        s11 = amax_leaf(x_ref[0], x_ref[1])
        s12 = amax_leaf(x_ref[2], x_ref[3])
        s21 = amax(s11, s12)
        s13 = amax_leaf(x_ref[4], x_ref[5])
        s14 = amax_leaf(x_ref[6], x_ref[7])
        s22 = amax(s13, s14)
        s3 = amax(s21, s22)
        x8 = x_ref[8] * sf + 0.5            # lone leaf enters at the last level
        o_ref[...] = amax_final(s3, x8)
    else:
        raise ValueError("kernel_size must be 2 or 3")


# ----------------------------------------------------------------------------
# Wrapper glue: padding, window extraction, range check, tiling.
# ----------------------------------------------------------------------------
def _round_up(a, b):
    return -(-a // b) * b


def _chip_params():
    """(num_tensorcores, max_tile_rows, vmem_limit_bytes) per chip generation."""
    kind = ""
    try:
        kind = jax.devices()[0].device_kind.lower()
    except Exception:  # pragma: no cover - defensive
        pass
    if "v7" in kind:
        # 2 TCs/chip, but only 64 MiB physical VMEM per TC -> keep 1024/32MiB.
        return 2, 1024, 32 * 1024 * 1024
    if "v4" in kind or "v5p" in kind:
        # megacore: 2 TCs behind one device.
        return 2, 1024, 64 * 1024 * 1024
    if "v5e" in kind or "v5 lite" in kind or "v6" in kind:
        # 1 TC, 128 MiB physical VMEM -> bigger tiles, fewer grid steps.
        return 1, 2048, 64 * 1024 * 1024
    # Unknown chip: conservative defaults (known-good on the sandbox TPU).
    return 1, 1024, 32 * 1024 * 1024


def _compute_pads(x_shape, kernel_size, stride, padding, ceil_check):
    N, C, W_init, H_init = x_shape
    if ceil_check:
        W_out = math.ceil((W_init + 2 * padding - kernel_size) / stride + 1)
        W_out_floor = math.floor((W_init + 2 * padding - kernel_size) / stride + 1)
        H_out = math.ceil((H_init + 2 * padding - kernel_size) / stride + 1)
        H_out_floor = math.floor((H_init + 2 * padding - kernel_size) / stride + 1)
        pad_right = W_out - W_out_floor
        pad_bottom = H_out - H_out_floor
        return ((0, 0), (0, 0),
                (padding, padding + pad_bottom),
                (padding, padding + pad_right))
    return ((0, 0), (0, 0), (padding, padding), (padding, padding))


def _extract_windows(xp, kernel_size, stride):
    """Returns (KK, M) window tensor plus output spatial dims."""
    N, C, W, H = xp.shape
    i_num = (W - kernel_size) // stride + 1
    j_num = (H - kernel_size) // stride + 1
    KK = kernel_size * kernel_size
    if stride == kernel_size:
        # Non-overlapping windows: a crop + reshape + transpose (single fused
        # XLA copy) instead of KK strided gathers + a stack.
        xc = xp[:, :, :kernel_size * i_num, :kernel_size * j_num]
        xc = xc.reshape(N, C, i_num, kernel_size, j_num, kernel_size)
        windows = jnp.transpose(xc, (3, 5, 0, 1, 2, 4))
    else:
        # TODO(synk): the overlapping path still materializes the KK-replicated
        # window tensor in HBM; avoiding it would need in-kernel gather DMA.
        wins = []
        for i in range(kernel_size):
            for j in range(kernel_size):
                wins.append(xp[:, :,
                               i:i + stride * i_num:stride,
                               j:j + stride * j_num:stride])
        windows = jnp.stack(wins, axis=0)
    return windows.reshape(KK, N * C * i_num * j_num), i_num, j_num


@functools.partial(
    jax.jit,
    static_argnames=("kernel_size", "stride", "padding", "ceil_check",
                     "scaling_factor", "max_tile_rows", "num_tc",
                     "vmem_limit_bytes"))
def _maxpool_core(x, *, kernel_size, stride, padding, ceil_check,
                  scaling_factor, max_tile_rows, num_tc, vmem_limit_bytes):
    """Jitted compute path. Returns (pooled output, max |window value|)."""
    N, C, W_init, H_init = x.shape
    x = x.astype(jnp.float32)

    # Like the torch reference, padded cells are zero-padded and take part in
    # the approximate max (they map to 0.5 after the affine).
    pads = _compute_pads((N, C, W_init, H_init), kernel_size, stride,
                         padding, ceil_check)
    xp = jnp.pad(x, pads)

    flat, i_num, j_num = _extract_windows(xp, kernel_size, stride)
    KK, M = flat.shape

    # rangeException semantics: checked on the extracted window values (same
    # set the torch module checks), returned as a scalar side output so the
    # wrapper stays traceable (no host sync in the compiled graph).
    max_abs = jnp.max(jnp.abs(flat))

    # ---- lane-dense (KK, R, 128) layout, tiled along R ----
    R = pl.cdiv(M, 128)
    R8 = _round_up(R, 8)                          # sublane-aligned row count
    nb = max(1, pl.cdiv(R8, max_tile_rows))       # number of grid steps
    min_blocks = 2 * num_tc                       # >=2 pipelined steps per TC
    if nb < min_blocks and R8 >= max(64, 16 * min_blocks):
        nb = min_blocks
    tile_r = _round_up(pl.cdiv(R8, nb), 8)
    nb = pl.cdiv(R8, tile_r)
    R_pad = nb * tile_r
    M_pad = R_pad * 128
    if M_pad != M:
        # Under jit this pad fuses with the extraction copy above.
        flat = jnp.pad(flat, ((0, 0), (0, M_pad - M)))
    x3 = flat.reshape(KK, R_pad, 128)

    kern = functools.partial(_maxpool_kernel,
                             kernel_size=kernel_size,
                             scaling_factor=scaling_factor)

    # Rough cost: ~20 VPU ops per pairwise approximate max, (KK-1) pairs/elem.
    cost = pl.CostEstimate(
        flops=20 * (KK - 1) * M_pad,
        transcendentals=0,
        bytes_accessed=4 * (KK + 1) * M_pad)

    out = pl.pallas_call(
        kern,
        out_shape=jax.ShapeDtypeStruct((R_pad, 128), jnp.float32),
        grid=(nb,),
        in_specs=[pl.BlockSpec((KK, tile_r, 128), lambda r: (0, r, 0))],
        out_specs=pl.BlockSpec((tile_r, 128), lambda r: (r, 0)),
        compiler_params=pltpu.CompilerParams(
            dimension_semantics=("parallel",),
            vmem_limit_bytes=vmem_limit_bytes),
        cost_estimate=cost,
    )(x3)

    pooled = out.reshape(-1)[:M].reshape(N, C, i_num, j_num)
    return pooled, max_abs


def maxpool_approx_pallas(x, maxpool_dict, maxpool_basic_dict, *,
                          check_range=True):
    kernel_size = maxpool_basic_dict['kernel_size']
    stride = maxpool_basic_dict['stride']
    padding = maxpool_basic_dict['padding']
    ceil_check = bool(maxpool_basic_dict.get('ceil', False))
    alpha = maxpool_dict['alpha']
    B = maxpool_dict['B']

    if kernel_size == 2:
        scaling_factor = (1.0 - 4.0 * 0.5 ** alpha) / (B * 2.0)
    elif kernel_size == 3:
        scaling_factor = (1.0 - 6.0 * 0.5 ** alpha) / (B * 2.0)
    else:
        raise ValueError("kernel_size must be 2 or 3")

    num_tc, max_tile_rows, vmem_limit_bytes = _chip_params()

    pooled, max_abs = _maxpool_core(
        x,
        kernel_size=int(kernel_size),
        stride=int(stride),
        padding=int(padding),
        ceil_check=ceil_check,
        scaling_factor=float(scaling_factor),
        max_tile_rows=int(max_tile_rows),
        num_tc=int(num_tc),
        vmem_limit_bytes=int(vmem_limit_bytes))

    if check_range:
        # Single scalar device->host transfer after the compiled computation.
        max_val = float(max_abs)
        if max_val > B:
            raise ValueError(
                f"STOP! There is an input value {max_val} for the approximate "
                f"max-pooling function (B={B}).")
    return pooled


# ----------------------------------------------------------------------------
# Pure-JAX reference of the same forward (padding + window slicing + the same
# deterministic sgn composition), float32 throughout.
# TODO(synk): the torch code promotes some intermediates to float64; we keep
# float32 (TPU-native).
# ----------------------------------------------------------------------------
def _maxpool_reference(x, maxpool_dict, maxpool_basic_dict):
    kernel_size = maxpool_basic_dict['kernel_size']
    stride = maxpool_basic_dict['stride']
    padding = maxpool_basic_dict['padding']
    ceil_check = maxpool_basic_dict.get('ceil', False)
    alpha = maxpool_dict['alpha']
    B = maxpool_dict['B']

    pads = _compute_pads(x.shape, kernel_size, stride, padding, ceil_check)
    xp = jnp.pad(x.astype(jnp.float32), pads)
    _, _, W, H = xp.shape
    i_num = (W - kernel_size) // stride + 1
    j_num = (H - kernel_size) // stride + 1
    wins = [xp[:, :, i:i + stride * i_num:stride, j:j + stride * j_num:stride]
            for i in range(kernel_size) for j in range(kernel_size)]
    if kernel_size == 2:
        sf = (1.0 - 4.0 * 0.5 ** alpha) / (B * 2.0)
    else:
        sf = (1.0 - 6.0 * 0.5 ** alpha) / (B * 2.0)
    xs = [w * sf + 0.5 for w in wins]
    if kernel_size == 2:
        res = _max_approx(_max_approx(xs[0], xs[1]),
                          _max_approx(xs[2], xs[3]))
    else:
        s21 = _max_approx(_max_approx(xs[0], xs[1]), _max_approx(xs[2], xs[3]))
        s22 = _max_approx(_max_approx(xs[4], xs[5]), _max_approx(xs[6], xs[7]))
        res = _max_approx(_max_approx(s21, s22), xs[8])
    return (res - 0.5) / sf


if __name__ == "__main__":
    key = jax.random.PRNGKey(0)
    k1, k2 = jax.random.split(key)

    # Case 1: 2x2 pooling, stride 2, no padding (fast reshape-based extraction).
    x1 = jax.random.uniform(k1, (2, 4, 16, 16), dtype=jnp.float32,
                            minval=-4.0, maxval=4.0)
    maxpool_dict = {'alpha': 7, 'B': 8.0}
    basic2 = {'kernel_size': 2, 'stride': 2, 'padding': 0}
    y1 = jax.block_until_ready(maxpool_approx_pallas(x1, maxpool_dict, basic2))
    assert y1.shape == (2, 4, 8, 8), y1.shape
    y1_ref = _maxpool_reference(x1, maxpool_dict, basic2)
    err1 = float(jnp.max(jnp.abs(y1 - y1_ref)))
    assert err1 < 2e-4, f"K=2 mismatch vs reference: {err1}"

    # Case 2: 3x3 pooling, stride 2, padding 1 (general strided-slice path).
    x2 = jax.random.uniform(k2, (1, 2, 9, 9), dtype=jnp.float32,
                            minval=-6.0, maxval=6.0)
    basic3 = {'kernel_size': 3, 'stride': 2, 'padding': 1}
    y2 = jax.block_until_ready(maxpool_approx_pallas(x2, maxpool_dict, basic3))
    assert y2.shape == (1, 2, 5, 5), y2.shape
    y2_ref = _maxpool_reference(x2, maxpool_dict, basic3)
    err2 = float(jnp.max(jnp.abs(y2 - y2_ref)))
    assert err2 < 2e-4, f"K=3 mismatch vs reference: {err2}"

    print("KERNEL_OK")
</pallas_src>

<mosaic_0001>
module attributes {stable_mosaic.version = 11 : i64} {
  func.func @_maxpool_kernel(%arg0: i32, %arg1: memref<4x8x128xf32, #tpu.memory_space<vmem>>, %arg2: memref<8x128xf32, #tpu.memory_space<vmem>>) attributes {dimension_semantics = [#tpu.dimension_semantics<parallel>], iteration_bounds = array<i64: 1>, scalar_prefetch = 0 : i64, scratch_operands = 0 : i64, tpu.core_type = #tpu.core_type<tc>, window_params = [{transform_indices = @transform_0, window_bounds = array<i64: 4, 8, 128>}, {transform_indices = @transform_1, window_bounds = array<i64: 8, 128>}]} {
    %c0 = arith.constant 0 : index
    %c0_0 = arith.constant 0 : index
    %c0_1 = arith.constant 0 : index
    %0 = vector.load %arg1[%c0, %c0_0, %c0_1] : memref<4x8x128xf32, #tpu.memory_space<vmem>>, vector<1x8x128xf32>
    %1 = vector.shape_cast %0 : vector<1x8x128xf32> to vector<8x128xf32>
    %c1 = arith.constant 1 : index
    %c0_2 = arith.constant 0 : index
    %c0_3 = arith.constant 0 : index
    %2 = vector.load %arg1[%c1, %c0_2, %c0_3] : memref<4x8x128xf32, #tpu.memory_space<vmem>>, vector<1x8x128xf32>
    %3 = vector.shape_cast %2 : vector<1x8x128xf32> to vector<8x128xf32>
    %4 = arith.subf %1, %3 : vector<8x128xf32>
    %cst = arith.constant 0.060546875 : f32
    %5 = vector.broadcast %cst : f32 to vector<8x128xf32>
    %6 = arith.mulf %4, %5 : vector<8x128xf32>
    %7 = arith.addf %1, %3 : vector<8x128xf32>
    %cst_4 = arith.constant 0.060546875 : f32
    %8 = vector.broadcast %cst_4 : f32 to vector<8x128xf32>
    %9 = arith.mulf %7, %8 : vector<8x128xf32>
    %cst_5 = arith.constant 1.000000e+00 : f32
    %10 = vector.broadcast %cst_5 : f32 to vector<8x128xf32>
    %11 = arith.addf %9, %10 : vector<8x128xf32>
    %12 = arith.mulf %6, %6 : vector<8x128xf32>
    %cst_6 = arith.constant 5.000000e-01 : f32
    %13 = vector.broadcast %cst_6 : f32 to vector<8x128xf32>
    %14 = arith.mulf %13, %12 : vector<8x128xf32>
    %cst_7 = arith.constant 1.500000e+00 : f32
    %15 = vector.broadcast %cst_7 : f32 to vector<8x128xf32>
    %16 = arith.subf %15, %14 : vector<8x128xf32>
    %17 = arith.mulf %6, %16 : vector<8x128xf32>
    %18 = arith.mulf %17, %17 : vector<8x128xf32>
    %cst_8 = arith.constant 5.000000e-01 : f32
    %19 = vector.broadcast %cst_8 : f32 to vector<8x128xf32>
    %20 = arith.mulf %19, %18 : vector<8x128xf32>
    %cst_9 = arith.constant 1.500000e+00 : f32
    %21 = vector.broadcast %cst_9 : f32 to vector<8x128xf32>
    %22 = arith.subf %21, %20 : vector<8x128xf32>
    %23 = arith.mulf %17, %22 : vector<8x128xf32>
    %24 = arith.mulf %23, %23 : vector<8x128xf32>
    %cst_10 = arith.constant 5.000000e-01 : f32
    %25 = vector.broadcast %cst_10 : f32 to vector<8x128xf32>
    %26 = arith.mulf %25, %24 : vector<8x128xf32>
    %cst_11 = arith.constant 1.500000e+00 : f32
    %27 = vector.broadcast %cst_11 : f32 to vector<8x128xf32>
    %28 = arith.subf %27, %26 : vector<8x128xf32>
    %29 = arith.mulf %23, %28 : vector<8x128xf32>
    %30 = arith.mulf %6, %29 : vector<8x128xf32>
    %31 = arith.addf %11, %30 : vector<8x128xf32>
    %cst_12 = arith.constant 5.000000e-01 : f32
    %32 = vector.broadcast %cst_12 : f32 to vector<8x128xf32>
    %33 = arith.mulf %31, %32 : vector<8x128xf32>
    %c2 = arith.constant 2 : index
    %c0_13 = arith.constant 0 : index
    %c0_14 = arith.constant 0 : index
    %34 = vector.load %arg1[%c2, %c0_13, %c0_14] : memref<4x8x128xf32, #tpu.memory_space<vmem>>, vector<1x8x128xf32>
    %35 = vector.shape_cast %34 : vector<1x8x128xf32> to vector<8x128xf32>
    %c3 = arith.constant 3 : index
    %c0_15 = arith.constant 0 : index
    %c0_16 = arith.constant 0 : index
    %36 = vector.load %arg1[%c3, %c0_15, %c0_16] : memref<4x8x128xf32, #tpu.memory_space<vmem>>, vector<1x8x128xf32>
    %37 = vector.shape_cast %36 : vector<1x8x128xf32> to vector<8x128xf32>
    %38 = arith.subf %35, %37 : vector<8x128xf32>
    %cst_17 = arith.constant 0.060546875 : f32
    %39 = vector.broadcast %cst_17 : f32 to vector<8x128xf32>
    %40 = arith.mulf %38, %39 : vector<8x128xf32>
    %41 = arith.addf %35, %37 : vector<8x128xf32>
    %cst_18 = arith.constant 0.060546875 : f32
    %42 = vector.broadcast %cst_18 : f32 to vector<8x128xf32>
    %43 = arith.mulf %41, %42 : vector<8x128xf32>
    %cst_19 = arith.constant 1.000000e+00 : f32
    %44 = vector.broadcast %cst_19 : f32 to vector<8x128xf32>
    %45 = arith.addf %43, %44 : vector<8x128xf32>
    %46 = arith.mulf %40, %40 : vector<8x128xf32>
    %cst_20 = arith.constant 5.000000e-01 : f32
    %47 = vector.broadcast %cst_20 : f32 to vector<8x128xf32>
    %48 = arith.mulf %47, %46 : vector<8x128xf32>
    %cst_21 = arith.constant 1.500000e+00 : f32
    %49 = vector.broadcast %cst_21 : f32 to vector<8x128xf32>
    %50 = arith.subf %49, %48 : vector<8x128xf32>
    %51 = arith.mulf %40, %50 : vector<8x128xf32>
    %52 = arith.mulf %51, %51 : vector<8x128xf32>
    %cst_22 = arith.constant 5.000000e-01 : f32
    %53 = vector.broadcast %cst_22 : f32 to vector<8x128xf32>
    %54 = arith.mulf %53, %52 : vector<8x128xf32>
    %cst_23 = arith.constant 1.500000e+00 : f32
    %55 = vector.broadcast %cst_23 : f32 to vector<8x128xf32>
    %56 = arith.subf %55, %54 : vector<8x128xf32>
    %57 = arith.mulf %51, %56 : vector<8x128xf32>
    %58 = arith.mulf %57, %57 : vector<8x128xf32>
    %cst_24 = arith.constant 5.000000e-01 : f32
    %59 = vector.broadcast %cst_24 : f32 to vector<8x128xf32>
    %60 = arith.mulf %59, %58 : vector<8x128xf32>
    %cst_25 = arith.constant 1.500000e+00 : f32
    %61 = vector.broadcast %cst_25 : f32 to vector<8x128xf32>
    %62 = arith.subf %61, %60 : vector<8x128xf32>
    %63 = arith.mulf %57, %62 : vector<8x128xf32>
    %64 = arith.mulf %40, %63 : vector<8x128xf32>
    %65 = arith.addf %45, %64 : vector<8x128xf32>
    %cst_26 = arith.constant 5.000000e-01 : f32
    %66 = vector.broadcast %cst_26 : f32 to vector<8x128xf32>
    %67 = arith.mulf %65, %66 : vector<8x128xf32>
    %68 = arith.subf %33, %67 : vector<8x128xf32>
    %69 = arith.addf %33, %67 : vector<8x128xf32>
    %cst_27 = arith.constant 1.000000e+00 : f32
    %70 = vector.broadcast %cst_27 : f32 to vector<8x128xf32>
    %71 = arith.subf %69, %70 : vector<8x128xf32>
    %72 = arith.mulf %68, %68 : vector<8x128xf32>
    %cst_28 = arith.constant 5.000000e-01 : f32
    %73 = vector.broadcast %cst_28 : f32 to vector<8x128xf32>
    %74 = arith.mulf %73, %72 : vector<8x128xf32>
    %cst_29 = arith.constant 1.500000e+00 : f32
    %75 = vector.broadcast %cst_29 : f32 to vector<8x128xf32>
    %76 = arith.subf %75, %74 : vector<8x128xf32>
    %77 = arith.mulf %68, %76 : vector<8x128xf32>
    %78 = arith.mulf %77, %77 : vector<8x128xf32>
    %cst_30 = arith.constant 5.000000e-01 : f32
    %79 = vector.broadcast %cst_30 : f32 to vector<8x128xf32>
    %80 = arith.mulf %79, %78 : vector<8x128xf32>
    %cst_31 = arith.constant 1.500000e+00 : f32
    %81 = vector.broadcast %cst_31 : f32 to vector<8x128xf32>
    %82 = arith.subf %81, %80 : vector<8x128xf32>
    %83 = arith.mulf %77, %82 : vector<8x128xf32>
    %84 = arith.mulf %83, %83 : vector<8x128xf32>
    %cst_32 = arith.constant 5.000000e-01 : f32
    %85 = vector.broadcast %cst_32 : f32 to vector<8x128xf32>
    %86 = arith.mulf %85, %84 : vector<8x128xf32>
    %cst_33 = arith.constant 1.500000e+00 : f32
    %87 = vector.broadcast %cst_33 : f32 to vector<8x128xf32>
    %88 = arith.subf %87, %86 : vector<8x128xf32>
    %89 = arith.mulf %83, %88 : vector<8x128xf32>
    %90 = arith.mulf %68, %89 : vector<8x128xf32>
    %91 = arith.addf %71, %90 : vector<8x128xf32>
    %cst_34 = arith.constant 8.25806427 : f32
    %92 = vector.broadcast %cst_34 : f32 to vector<8x128xf32>
    %93 = arith.mulf %91, %92 : vector<8x128xf32>
    %c0_35 = arith.constant 0 : index
    %c0_36 = arith.constant 0 : index
    %94 = vector.load %arg2[%c0_35, %c0_36] : memref<8x128xf32, #tpu.memory_space<vmem>>, vector<8x128xf32>
    tpu.vector_store %arg2[%c0_35, %c0_36], %93 {strides = array<i32>} : memref<8x128xf32, #tpu.memory_space<vmem>>, vector<8x128xf32>,
    return
  }
  func.func @transform_0(%arg0: i32) -> (i32, i32, i32) {
    %c0_i32 = arith.constant 0 : i32
    %c0_i32_0 = arith.constant 0 : i32
    %c0_i32_1 = arith.constant 0 : i32
    return %c0_i32, %arg0, %c0_i32_0 : i32, i32, i32
  }
  func.func @transform_1(%arg0: i32) -> (i32, i32) {
    %c0_i32 = arith.constant 0 : i32
    %c0_i32_0 = arith.constant 0 : i32
    return %arg0, %c0_i32 : i32, i32
  }
}

</mosaic_0001>

<bundles_post_ra>
// kernel: _maxpool_core.1
= control target key start
LH: loop header
LB: loop body
LE: loop exit
PB: predicated region body
PF: predicated region fallthrough
CT: control target
= control target key end

     0   :  { %s107_s0 = inlined_call_operand.vmem [shape: f32[4,8,128], index: 0, kind: input, shape index: {}]   ;;  %s108_s1 = inlined_call_operand.vmem [shape: f32[8,128], index: 1, kind: output, shape index: {}]  }
   0x1   :  { %v8_v0 = vld [vmem:[%s107_s0] sm:$0xff]  ;;  %v78_v1 = vld [vmem:[%s107_s0 + $0x8] sm:$0xff]  ;;  %v79_v2 = vld [vmem:[%s107_s0 + $0x10] sm:$0xff] }
   0x2   :  { %v11_v3 = vsub.f32 %v8_v0, %v78_v1  ;;  %v80_v4 = vld [vmem:[%s107_s0 + $0x18] sm:$0xff]  ;;  %v13_v22 = vadd.f32 %v78_v1, %v8_v0 }
   0x3   :  { %v35_v5 = vsub.f32 %v79_v2, %v80_v4  ;;  %v37_v24 = vadd.f32 %v80_v4, %v79_v2 }
   0x4   :  { %v12_v6 = vmul.f32 0.060546875, %v11_v3  ;;  %v14_v28 = vmul.f32 0.060546875, %v13_v22 }
   0x5   :  { %v36_v7 = vmul.f32 0.060546875, %v35_v5  ;;  %v38_v30 = vmul.f32 0.060546875, %v37_v24 }
   0x6   :  { %v16_v8 = vmul.f32 %v12_v6, %v12_v6  ;;  %v15_v34 = vadd.f32 1.0, %v14_v28 }
   0x7   :  { %v40_v9 = vmul.f32 %v36_v7, %v36_v7  ;;  %v39_v36 = vadd.f32 1.0, %v38_v30 }
   0x8   :  { %v17_v10 = vmul.f32 0.5, %v16_v8 }
   0x9   :  { %v41_v11 = vmul.f32 0.5, %v40_v9 }
   0xa   :  { %v18_v12 = vsub.f32 1.5, %v17_v10 }
   0xb   :  { %v42_v13 = vsub.f32 1.5, %v41_v11 }
   0xc   :  { %v19_v14 = vmul.f32 %v18_v12, %v12_v6 }
   0xd   :  { %v43_v15 = vmul.f32 %v42_v13, %v36_v7 }
   0xe   :  { %v20_v16 = vmul.f32 %v19_v14, %v19_v14 }
   0xf   :  { %v44_v17 = vmul.f32 %v43_v15, %v43_v15 }
  0x10   :  { %v21_v18 = vmul.f32 0.5, %v20_v16 }
  0x11   :  { %v45_v19 = vmul.f32 0.5, %v44_v17 }
  0x12   :  { %v22_v20 = vsub.f32 1.5, %v21_v18 }
  0x13   :  { %v46_v21 = vsub.f32 1.5, %v45_v19 }
  0x14   :  { %v23_v23 = vmul.f32 %v22_v20, %v19_v14 }
  0x15   :  { %v47_v25 = vmul.f32 %v46_v21, %v43_v15 }
  0x16   :  { %v24_v26 = vmul.f32 %v23_v23, %v23_v23 }
  0x17   :  { %v48_v27 = vmul.f32 %v47_v25, %v47_v25 }
  0x18   :  { %v25_v29 = vmul.f32 0.5, %v24_v26 }
  0x19   :  { %v49_v31 = vmul.f32 0.5, %v48_v27 }
  0x1a   :  { %v26_v32 = vsub.f32 1.5, %v25_v29 }
  0x1b   :  { %v50_v33 = vsub.f32 1.5, %v49_v31 }
  0x1c   :  { %v27_v35 = vmul.f32 %v26_v32, %v23_v23 }
  0x1d   :  { %v51_v37 = vmul.f32 %v50_v33, %v47_v25 }
  0x1e   :  { %v28_v38 = vmul.f32 %v27_v35, %v12_v6 }
  0x1f   :  { %v52_v39 = vmul.f32 %v51_v37, %v36_v7 }
  0x20   :  { %v29_v40 = vadd.f32 %v28_v38, %v15_v34 }
  0x21   :  { %v53_v41 = vadd.f32 %v52_v39, %v39_v36 }
  0x22   :  { %v30_v42 = vmul.f32 0.5, %v29_v40 }
  0x23   :  { %v54_v43 = vmul.f32 0.5, %v53_v41 }
  0x25   :  { %v55_v44 = vsub.f32 %v30_v42, %v54_v43  ;;  %v56_v54 = vadd.f32 %v54_v43, %v30_v42 }
  0x27   :  { %v58_v45 = vmul.f32 %v55_v44, %v55_v44  ;;  %v81_v57 = vadd.f32 -1.0, %v56_v54 }
  0x29   :  { %v59_v46 = vmul.f32 0.5, %v58_v45 }
  0x2b   :  { %v60_v47 = vsub.f32 1.5, %v59_v46 }
  0x2d   :  { %v61_v48 = vmul.f32 %v60_v47, %v55_v44 }
  0x2f   :  { %v62_v49 = vmul.f32 %v61_v48, %v61_v48 }
  0x31   :  { %v63_v50 = vmul.f32 0.5, %v62_v49 }
  0x33   :  { %v64_v51 = vsub.f32 1.5, %v63_v50 }
  0x35   :  { %v65_v52 = vmul.f32 %v64_v51, %v61_v48 }
  0x37   :  { %v66_v53 = vmul.f32 %v65_v52, %v65_v52 }
  0x39   :  { %v67_v55 = vmul.f32 0.5, %v66_v53 }
  0x3b   :  { %v68_v56 = vsub.f32 1.5, %v67_v55 }
  0x3d   :  { %v69_v58 = vmul.f32 %v68_v56, %v65_v52 }
  0x3f   :  { %v70_v59 = vmul.f32 %v69_v58, %v55_v44 }
  0x41   :  { %v71_v60 = vadd.f32 %v81_v57, %v70_v59 }
  0x43   :  { %v72_v61 = vmul.f32 8.258064, %v71_v60 }
  0x45   :  { %73 = vst [vmem:[%s108_s1] sm:$0xff] %v72_v61 }

</bundles_post_ra>
